<compile_context>
chip_gen: v7x
topology: tpu7x:2x2x1
jax: 0.10.0
libtpu: 0.0.40
codegen_flags: <defaults>
</compile_context>

<pallas_src>
import math

import jax
import jax.numpy as jnp
from jax import lax
from jax.experimental import pallas as pl
from jax.experimental.pallas import tpu as pltpu


def _round_up(x, m):
    return ((x + m - 1) // m) * m


def _critic_kernel(s_ref, a_ref, w1s_ref, w1a_ref, b1_ref,
                   w2_ref, b2_ref, w3_ref, b3_ref, out_ref):
    # Cast matmul operands to bf16 (no-op if already bf16); accumulate in f32.
    s = s_ref[...].astype(jnp.bfloat16)                       # (Bt, Sd)
    a = a_ref[...].astype(jnp.bfloat16)                       # (Bt, Ad)

    # Fused concat:  [s, a] @ W1  ==  s @ W1[:Sd]  +  a @ W1[Sd:]
    h1 = jnp.dot(s, w1s_ref[...], preferred_element_type=jnp.float32)
    h1 = h1 + jnp.dot(a, w1a_ref[...], preferred_element_type=jnp.float32)
    h1 = jnp.maximum(h1 + b1_ref[...], 0.0)                   # f32 (Bt, H1)

    h2 = jnp.dot(h1.astype(jnp.bfloat16), w2_ref[...],
                 preferred_element_type=jnp.float32)
    h2 = jnp.maximum(h2 + b2_ref[...], 0.0)                   # f32 (Bt, H2)

    # Final (H2 -> 1) layer, contracted against h2's last dim so the result
    # is (1, Bt): lane-dense output tile (batch on the lane axis).
    y = lax.dot_general(w3_ref[...], h2.astype(jnp.bfloat16),
                        dimension_numbers=(((1,), (1,)), ((), ())),
                        preferred_element_type=jnp.float32)   # (1, Bt)
    out_ref[...] = (y + b3_ref[...]).astype(out_ref.dtype)


def _pick_block_b(batch, state_dim, action_dim, hidden_1, hidden_2):
    """Largest batch tile under a ~10 MiB per-step VMEM budget (safe even on
    v5e's 16 MiB scoped default), kept small enough that the grid has >= 2
    steps for v7x's two TensorCores when the batch allows it."""
    if batch <= 512:
        # Single tile exactly equal to the batch: block dims == array dims,
        # so the (8,128) tiling rule is satisfied with zero padding.
        return batch

    # Per-row VMEM bytes: f32 state/action/output double-buffered by the
    # pipeline + f32 h1/h2 intermediates.  Resident weights are tiny.
    per_row = (2 * (state_dim + action_dim + 1) + (hidden_1 + hidden_2)) * 4
    budget = 10 << 20
    block_b = 256
    for cand in (4096, 2048, 1024, 512, 256):
        if cand * per_row <= budget:
            block_b = cand
            break
    # Keep >= 2 grid steps; multiple of 128 keeps the lane-dense output block
    # legal (last block dim must be a multiple of 128 when it isn't the full
    # array) and its stores unmasked.
    return min(block_b, _round_up(pl.cdiv(batch, 2), 128))


def critic_forward(state, action, params):
    """state: (B, state_dim), action: (B, action_dim) -> (B, 1) f32."""
    w1s, w1a, b1, w2, b2, w3, b3 = params
    batch, state_dim = state.shape
    action_dim = action.shape[1]
    hidden_1 = w1s.shape[1]
    hidden_2 = w2.shape[1]

    block_b = _pick_block_b(batch, state_dim, action_dim, hidden_1, hidden_2)
    grid_b = pl.cdiv(batch, block_b)
    padded_b = grid_b * block_b            # output padded; inputs NOT padded

    # Weights/biases: whole array resident in VMEM, grid-invariant.
    vmem = pl.BlockSpec(memory_space=pltpu.MemorySpace.VMEM)

    out = pl.pallas_call(
        _critic_kernel,
        out_shape=jax.ShapeDtypeStruct((1, padded_b), jnp.float32),
        grid=(grid_b,),
        in_specs=[
            pl.BlockSpec((block_b, state_dim), lambda i: (i, 0)),   # state
            pl.BlockSpec((block_b, action_dim), lambda i: (i, 0)),  # action
            vmem, vmem, vmem,                                       # W1s,W1a,b1
            vmem, vmem,                                             # W2,b2
            vmem, vmem,                                             # W3,b3
        ],
        out_specs=pl.BlockSpec((1, block_b), lambda i: (0, i)),
        compiler_params=pltpu.CompilerParams(
            dimension_semantics=("parallel",)),   # shards batch tiles on v7x
    )(state, action, w1s, w1a, b1, w2, b2, w3, b3)

    # Lane-dense (1, padded_B) -> (B, 1)  (metadata reshape + cheap slice).
    return out[0, :batch].reshape(batch, 1)


def init_critic_params(key, state_dim, action_dim, hidden_1, hidden_2):
    """nn.Linear-style init (U[-1/sqrt(fan_in), +1/sqrt(fan_in)]).

    Layer-1 weight is pre-split along its input dim (state rows / action
    rows) so the concat fuses into the kernel; weights are stored in bf16,
    biases in f32.  Layer-3 weight is kept as (1, hidden_2) (PyTorch layout).
    """
    def linear(key, fan_in, fan_out):
        kw, kb = jax.random.split(key)
        bound = 1.0 / math.sqrt(fan_in)
        w = jax.random.uniform(kw, (fan_in, fan_out), jnp.float32,
                               minval=-bound, maxval=bound)
        b = jax.random.uniform(kb, (1, fan_out), jnp.float32,
                               minval=-bound, maxval=bound)
        return w, b

    k1, k2, k3 = jax.random.split(key, 3)
    w1, b1 = linear(k1, state_dim + action_dim, hidden_1)
    w2, b2 = linear(k2, hidden_1, hidden_2)
    w3, b3 = linear(k3, hidden_2, 1)

    w1s = w1[:state_dim].astype(jnp.bfloat16)       # (state_dim,  H1)
    w1a = w1[state_dim:].astype(jnp.bfloat16)       # (action_dim, H1)
    w2 = w2.astype(jnp.bfloat16)                    # (H1, H2)
    w3t = w3.T.astype(jnp.bfloat16)                 # (1, H2)
    return (w1s, w1a, b1, w2, b2, w3t, b3)


def critic_reference(state, action, params):
    """Pure-JAX reference using the same bf16-operand / f32-accumulate math."""
    w1s, w1a, b1, w2, b2, w3, b3 = params
    h1 = (jnp.dot(state.astype(jnp.bfloat16), w1s,
                  preferred_element_type=jnp.float32)
          + jnp.dot(action.astype(jnp.bfloat16), w1a,
                    preferred_element_type=jnp.float32))
    h1 = jnp.maximum(h1 + b1, 0.0)
    h2 = jnp.dot(h1.astype(jnp.bfloat16), w2,
                 preferred_element_type=jnp.float32)
    h2 = jnp.maximum(h2 + b2, 0.0)
    y = jnp.dot(h2.astype(jnp.bfloat16), w3.T,
                preferred_element_type=jnp.float32) + b3
    return y


if __name__ == "__main__":
    key = jax.random.PRNGKey(0)
    k_params, k_state, k_action, k_state2, k_action2 = jax.random.split(key, 5)

    # Small shapes consistent with Critic(state_dim, action_dim, h1, h2).
    state_dim, action_dim = 8, 4
    hidden_1, hidden_2 = 32, 64
    params = init_critic_params(k_params, state_dim, action_dim,
                                hidden_1, hidden_2)

    # Case 1: tiny batch (single exact tile, grid=1).
    batch = 2
    state = jax.random.normal(k_state, (batch, state_dim), jnp.float32)
    action = jax.random.normal(k_action, (batch, action_dim), jnp.float32)
    out = jax.block_until_ready(critic_forward(state, action, params))
    ref = critic_reference(state, action, params)
    assert out.shape == (batch, 1), out.shape
    assert jnp.allclose(out, ref, atol=1e-2, rtol=1e-2), (out, ref)

    # Case 2: misaligned batch that exercises the tiled grid (>=2 steps) and
    # the ragged tail block (no wrapper-side padding).
    batch2 = 1000
    state2 = jax.random.normal(k_state2, (batch2, state_dim), jnp.float32)
    action2 = jax.random.normal(k_action2, (batch2, action_dim), jnp.float32)
    out2 = jax.block_until_ready(critic_forward(state2, action2, params))
    ref2 = critic_reference(state2, action2, params)
    assert out2.shape == (batch2, 1), out2.shape
    assert jnp.allclose(out2, ref2, atol=1e-2, rtol=1e-2)

    print("KERNEL_OK")
</pallas_src>

<mosaic_0001>
module attributes {stable_mosaic.version = 11 : i64} {
  func.func @_critic_kernel(%arg0: i32, %arg1: memref<2x8xf32, #tpu.memory_space<vmem>>, %arg2: memref<2x4xf32, #tpu.memory_space<vmem>>, %arg3: memref<8x32xbf16, #tpu.memory_space<vmem>>, %arg4: memref<4x32xbf16, #tpu.memory_space<vmem>>, %arg5: memref<1x32xf32, #tpu.memory_space<vmem>>, %arg6: memref<32x64xbf16, #tpu.memory_space<vmem>>, %arg7: memref<1x64xf32, #tpu.memory_space<vmem>>, %arg8: memref<1x64xbf16, #tpu.memory_space<vmem>>, %arg9: memref<1x1xf32, #tpu.memory_space<vmem>>, %arg10: memref<1x2xf32, #tpu.memory_space<vmem>>) attributes {dimension_semantics = [#tpu.dimension_semantics<parallel>], iteration_bounds = array<i64: 1>, scalar_prefetch = 0 : i64, scratch_operands = 0 : i64, tpu.core_type = #tpu.core_type<tc>, window_params = [{transform_indices = @transform_0, window_bounds = array<i64: 2, 8>}, {transform_indices = @transform_1, window_bounds = array<i64: 2, 4>}, {pipeline_mode = #tpu.pipeline_mode<synchronous>, transform_indices = @transform_2, window_bounds = array<i64: 8, 32>}, {pipeline_mode = #tpu.pipeline_mode<synchronous>, transform_indices = @transform_3, window_bounds = array<i64: 4, 32>}, {pipeline_mode = #tpu.pipeline_mode<synchronous>, transform_indices = @transform_4, window_bounds = array<i64: 1, 32>}, {pipeline_mode = #tpu.pipeline_mode<synchronous>, transform_indices = @transform_5, window_bounds = array<i64: 32, 64>}, {pipeline_mode = #tpu.pipeline_mode<synchronous>, transform_indices = @transform_6, window_bounds = array<i64: 1, 64>}, {pipeline_mode = #tpu.pipeline_mode<synchronous>, transform_indices = @transform_7, window_bounds = array<i64: 1, 64>}, {pipeline_mode = #tpu.pipeline_mode<synchronous>, transform_indices = @transform_8, window_bounds = array<i64: 1, 1>}, {transform_indices = @transform_9, window_bounds = array<i64: 1, 2>}]} {
    %c0 = arith.constant 0 : index
    %c0_0 = arith.constant 0 : index
    %0 = vector.load %arg1[%c0, %c0_0] : memref<2x8xf32, #tpu.memory_space<vmem>>, vector<2x8xf32>
    %1 = arith.truncf %0 : vector<2x8xf32> to vector<2x8xbf16>
    %c0_1 = arith.constant 0 : index
    %c0_2 = arith.constant 0 : index
    %2 = vector.load %arg2[%c0_1, %c0_2] : memref<2x4xf32, #tpu.memory_space<vmem>>, vector<2x4xf32>
    %3 = arith.truncf %2 : vector<2x4xf32> to vector<2x4xbf16>
    %c0_3 = arith.constant 0 : index
    %c0_4 = arith.constant 0 : index
    %4 = vector.load %arg3[%c0_3, %c0_4] : memref<8x32xbf16, #tpu.memory_space<vmem>>, vector<8x32xbf16>
    %cst = arith.constant dense<0.000000e+00> : vector<2x32xf32>
    %5 = tpu.matmul %1, %4, %cst {dimension_numbers = #tpu.dot_dimension_numbers<[1], [0], [0], [1], [0, 0, 1, 1], [], []>} : vector<2x8xbf16>, vector<8x32xbf16>, vector<2x32xf32> -> vector<2x32xf32>
    %c0_5 = arith.constant 0 : index
    %c0_6 = arith.constant 0 : index
    %6 = vector.load %arg4[%c0_5, %c0_6] : memref<4x32xbf16, #tpu.memory_space<vmem>>, vector<4x32xbf16>
    %cst_7 = arith.constant dense<0.000000e+00> : vector<2x32xf32>
    %7 = tpu.matmul %3, %6, %cst_7 {dimension_numbers = #tpu.dot_dimension_numbers<[1], [0], [0], [1], [0, 0, 1, 1], [], []>} : vector<2x4xbf16>, vector<4x32xbf16>, vector<2x32xf32> -> vector<2x32xf32>
    %8 = arith.addf %5, %7 : vector<2x32xf32>
    %c0_8 = arith.constant 0 : index
    %c0_9 = arith.constant 0 : index
    %9 = vector.load %arg5[%c0_8, %c0_9] : memref<1x32xf32, #tpu.memory_space<vmem>>, vector<1x32xf32>
    %10 = vector.broadcast %9 : vector<1x32xf32> to vector<2x32xf32>
    %11 = arith.addf %8, %10 : vector<2x32xf32>
    %cst_10 = arith.constant 0.000000e+00 : f32
    %12 = vector.broadcast %cst_10 : f32 to vector<2x32xf32>
    %13 = arith.maximumf %11, %12 : vector<2x32xf32>
    %14 = arith.truncf %13 : vector<2x32xf32> to vector<2x32xbf16>
    %c0_11 = arith.constant 0 : index
    %c0_12 = arith.constant 0 : index
    %15 = vector.load %arg6[%c0_11, %c0_12] : memref<32x64xbf16, #tpu.memory_space<vmem>>, vector<32x64xbf16>
    %cst_13 = arith.constant dense<0.000000e+00> : vector<2x64xf32>
    %16 = tpu.matmul %14, %15, %cst_13 {dimension_numbers = #tpu.dot_dimension_numbers<[1], [0], [0], [1], [0, 0, 1, 1], [], []>} : vector<2x32xbf16>, vector<32x64xbf16>, vector<2x64xf32> -> vector<2x64xf32>
    %c0_14 = arith.constant 0 : index
    %c0_15 = arith.constant 0 : index
    %17 = vector.load %arg7[%c0_14, %c0_15] : memref<1x64xf32, #tpu.memory_space<vmem>>, vector<1x64xf32>
    %18 = vector.broadcast %17 : vector<1x64xf32> to vector<2x64xf32>
    %19 = arith.addf %16, %18 : vector<2x64xf32>
    %cst_16 = arith.constant 0.000000e+00 : f32
    %20 = vector.broadcast %cst_16 : f32 to vector<2x64xf32>
    %21 = arith.maximumf %19, %20 : vector<2x64xf32>
    %c0_17 = arith.constant 0 : index
    %c0_18 = arith.constant 0 : index
    %22 = vector.load %arg8[%c0_17, %c0_18] : memref<1x64xbf16, #tpu.memory_space<vmem>>, vector<1x64xbf16>
    %23 = arith.truncf %21 : vector<2x64xf32> to vector<2x64xbf16>
    %cst_19 = arith.constant dense<0.000000e+00> : vector<1x2xf32>
    %24 = tpu.matmul %22, %23, %cst_19 {dimension_numbers = #tpu.dot_dimension_numbers<[1], [1], [0], [0], [0, 0, 1, 0], [], []>} : vector<1x64xbf16>, vector<2x64xbf16>, vector<1x2xf32> -> vector<1x2xf32>
    %c0_20 = arith.constant 0 : index
    %c0_21 = arith.constant 0 : index
    %25 = vector.load %arg9[%c0_20, %c0_21] : memref<1x1xf32, #tpu.memory_space<vmem>>, vector<1x1xf32>
    %26 = vector.broadcast %25 : vector<1x1xf32> to vector<1x2xf32>
    %27 = arith.addf %24, %26 : vector<1x2xf32>
    %c0_22 = arith.constant 0 : index
    %c0_23 = arith.constant 0 : index
    %28 = vector.load %arg10[%c0_22, %c0_23] : memref<1x2xf32, #tpu.memory_space<vmem>>, vector<1x2xf32>
    tpu.vector_store %arg10[%c0_22, %c0_23], %27 {strides = array<i32>} : memref<1x2xf32, #tpu.memory_space<vmem>>, vector<1x2xf32>,
    return
  }
  func.func @transform_0(%arg0: i32) -> (i32, i32) {
    %c0_i32 = arith.constant 0 : i32
    %c0_i32_0 = arith.constant 0 : i32
    return %arg0, %c0_i32 : i32, i32
  }
  func.func @transform_1(%arg0: i32) -> (i32, i32) {
    %c0_i32 = arith.constant 0 : i32
    %c0_i32_0 = arith.constant 0 : i32
    return %arg0, %c0_i32 : i32, i32
  }
  func.func @transform_2(%arg0: i32) -> (i32, i32) {
    %c0_i32 = arith.constant 0 : i32
    %c0_i32_0 = arith.constant 0 : i32
    %c0_i32_1 = arith.constant 0 : i32
    return %c0_i32, %c0_i32_0 : i32, i32
  }
  func.func @transform_3(%arg0: i32) -> (i32, i32) {
    %c0_i32 = arith.constant 0 : i32
    %c0_i32_0 = arith.constant 0 : i32
    %c0_i32_1 = arith.constant 0 : i32
    return %c0_i32, %c0_i32_0 : i32, i32
  }
  func.func @transform_4(%arg0: i32) -> (i32, i32) {
    %c0_i32 = arith.constant 0 : i32
    %c0_i32_0 = arith.constant 0 : i32
    %c0_i32_1 = arith.constant 0 : i32
    return %c0_i32, %c0_i32_0 : i32, i32
  }
  func.func @transform_5(%arg0: i32) -> (i32, i32) {
    %c0_i32 = arith.constant 0 : i32
    %c0_i32_0 = arith.constant 0 : i32
    %c0_i32_1 = arith.constant 0 : i32
    return %c0_i32, %c0_i32_0 : i32, i32
  }
  func.func @transform_6(%arg0: i32) -> (i32, i32) {
    %c0_i32 = arith.constant 0 : i32
    %c0_i32_0 = arith.constant 0 : i32
    %c0_i32_1 = arith.constant 0 : i32
    return %c0_i32, %c0_i32_0 : i32, i32
  }
  func.func @transform_7(%arg0: i32) -> (i32, i32) {
    %c0_i32 = arith.constant 0 : i32
    %c0_i32_0 = arith.constant 0 : i32
    %c0_i32_1 = arith.constant 0 : i32
    return %c0_i32, %c0_i32_0 : i32, i32
  }
  func.func @transform_8(%arg0: i32) -> (i32, i32) {
    %c0_i32 = arith.constant 0 : i32
    %c0_i32_0 = arith.constant 0 : i32
    %c0_i32_1 = arith.constant 0 : i32
    return %c0_i32, %c0_i32_0 : i32, i32
  }
  func.func @transform_9(%arg0: i32) -> (i32, i32) {
    %c0_i32 = arith.constant 0 : i32
    %c0_i32_0 = arith.constant 0 : i32
    return %c0_i32, %arg0 : i32, i32
  }
}

</mosaic_0001>

<bundles_post_ra>
// kernel: tpu_custom_call.1
= control target key start
LH: loop header
LB: loop body
LE: loop exit
PB: predicated region body
PF: predicated region fallthrough
CT: control target
= control target key end

     0   :  { %s605_s0 = inlined_call_operand.vmem [shape: f32[2,8], index: 0, kind: input, shape index: {}]   ;;  %s606_s1 = inlined_call_operand.hbm [shape: f32[2,4], index: 1, kind: input, shape index: {}]   ;;  %s607_s2 = inlined_call_operand.vmem [shape: bf16[8,32], index: 2, kind: input, shape index: {}]   ;;  %s608_s3 = inlined_call_operand.hbm [shape: bf16[4,32], index: 3, kind: input, shape index: {}]   ;;  %s609_s4 = inlined_call_operand.hbm [shape: f32[1,32], index: 4, kind: input, shape index: {}]   ;;  %s610_s5 = inlined_call_operand.vmem [shape: bf16[32,64], index: 5, kind: input, shape index: {}]   ;;  %s611_s6 = inlined_call_operand.vmem [shape: f32[1,64], index: 6, kind: input, shape index: {}]   ;;  %s612_s7 = inlined_call_operand.vmem [shape: bf16[1,64], index: 7, kind: input, shape index: {}]   ;;  %s613_s8 = inlined_call_operand.<no memory space> [shape: f32[1,1], index: 8, kind: input, shape index: {}]   ;;  %s614_s9 = inlined_call_operand.hbm [shape: f32[1,2], index: 9, kind: output, shape index: {}]  }
   0x1   :  { %v14_v0 = vstv %s613_s8 }
   0x2   :  { %15 = vst [vmem:[#allocation2] sm:$0x1] %v14_v0 }
   0x3   :  { %16 = vsyncpa [#allocation4], 0 }
   0x4   :  { %17 = vsyncpa [#allocation7], 0 }
   0x5   :  { %18 = vsyncpa [#allocation5], 0  ;;  %s475_s11 = smov [#allocation6]   ;;  %s476_s13 = smov [#allocation3]  }
   0x6   :  { %s39_s12 = sshll.u32 %s475_s11, 4  ;;  %s27_s14 = sshll.u32 %s476_s13, 4  ;;  %s40_s12 = int_to_ptr.vmem [resolvable:$true] %s39_s12  ;;  %s28_s14 = int_to_ptr.vmem [resolvable:$true] %s27_s14 }
   0x7   :  { %s381_s17 = scalar_lea.hbm %s608_s3, 32 }
   0x8   :  { %p382_p0 = scmp.ne.s32.totalorder %s608_s3, %s381_s17  ;;  %p385_p1 = scmp.lt.u32.totalorder %s381_s17, %s608_s3 }
   0xa   :  { %p387_p2 = pnand %p385_p1, %p382_p0 }
   0xc   :  { %390 = shalt.err (!%p387_p2)
}
   0xd   :  { %s391_s21 = scalar_lea.vmem %s40_s12, 32  ;;  %p396_p4 = scmp.lt.s32.totalorder %s40_s12, %s40_s12 }
   0xe   :  { %p392_p3 = scmp.ne.s32.totalorder %s40_s12, %s391_s21  ;;  %p397_p5 = scmp.lt.s32.totalorder %s391_s21, %s391_s21 }
  0x10   :  { %p398_p6 = por %p397_p5, %p396_p4 }
  0x12   :  { %p399_p7 = pnand %p398_p6, %p392_p3 }
  0x14   :  { %402 = shalt.err (!%p399_p7)
}
  0x15   :  { %42 = dma.hbm_to_vmem [thread:$0]  %s608_s3, 32, %s40_s12, [#allocation7]  }
  0x16   :  { %s403_s26 = scalar_lea.hbm %s606_s1, 32 }
  0x17   :  { %p404_p8 = scmp.ne.s32.totalorder %s606_s1, %s403_s26  ;;  %p407_p9 = scmp.lt.u32.totalorder %s403_s26, %s606_s1 }
  0x19   :  { %p409_p10 = pnand %p407_p9, %p404_p8 }
  0x1b   :  { %412 = shalt.err (!%p409_p10)
}
  0x1c   :  { %s413_s10 = scalar_lea.vmem %s28_s14, 32  ;;  %p418_p12 = scmp.lt.s32.totalorder %s28_s14, %s28_s14 }
  0x1d   :  { %p414_p11 = scmp.ne.s32.totalorder %s28_s14, %s413_s10  ;;  %p419_p13 = scmp.lt.s32.totalorder %s413_s10, %s413_s10 }
  0x1f   :  { %p420_p0 = por %p419_p13, %p418_p12 }
  0x21   :  { %p421_p1 = pnand %p420_p0, %p414_p11 }
  0x23   :  { %424 = shalt.err (!%p421_p1)
}
  0x24   :  { %30 = dma.hbm_to_vmem [thread:$0]  %s606_s1, 32, %s28_s14, [#allocation4]  }
  0x25   :  { %s477_s12 = smov [#allocation8]   ;;  %s425_s17 = scalar_lea.hbm %s609_s4, 16 }
  0x26   :  { %s49_s13 = sshll.u32 %s477_s12, 4  ;;  %p426_p2 = scmp.ne.s32.totalorder %s609_s4, %s425_s17  ;;  %s50_s13 = int_to_ptr.vmem [resolvable:$true] %s49_s13 }
  0x27   :  { %p429_p3 = scmp.lt.u32.totalorder %s425_s17, %s609_s4 }
  0x29   :  { %p431_p4 = pnand %p429_p3, %p426_p2 }
  0x2b   :  { %434 = shalt.err (!%p431_p4)
}
  0x2c   :  { %s435_s21 = scalar_lea.vmem %s50_s13, 16  ;;  %s439_s1 = scalar_lea.vmem %s50_s13, 32 }
  0x2d   :  { %p436_p5 = scmp.ne.s32.totalorder %s50_s13, %s435_s21  ;;  %p440_p6 = scmp.lt.s32.totalorder %s50_s13, %s50_s13 }
  0x2e   :  { %p441_p7 = scmp.lt.s32.totalorder %s439_s1, %s435_s21 }
  0x30   :  { %p442_p8 = por %p441_p7, %p440_p6 }
  0x32   :  { %p443_p9 = pnand %p442_p8, %p436_p5 }
  0x34   :  { %446 = shalt.err (!%p443_p9)
}
  0x35   :  { %52 = dma.hbm_to_vmem [thread:$0]  %s609_s4, 16, %s50_s13, [#allocation7]  }
  0x36   :  { %469 = dma.done.wait [#allocation4], 32  }
  0x37   :  { %470 = vsyncadd [#allocation4], 4294967264 }
  0x38   :  { %471 = dma.done.wait [#allocation7], 48  }
  0x39   :  { %472 = vsyncadd [#allocation7], 4294967248  ;;  %v478_v1 = vmov 0.0   ;;  %vm479_vm0 = vmmov 0   ;;  %vm81_vm1 = vcmask 1041408   ;;  %vm129_vm2 = vcmask 1043456  }
  0x3a   :  { %345 = vmatprep.subr.bf16.mxu0 %v478_v1  ;;  %351 = vmatprep.subr.bf16.mxu1 %v478_v1  ;;  %vm77_vm3 = vcmask 31744   ;;  %vm125_vm4 = vcmask 64512   ;;  %v76_v2 = vld [vmem:[#allocation6] sm:$0x3]  ;;  %v73_v4 = vld [vmem:[#allocation3] sm:$0x3]  ;;  %v259_v37 = vlaneseq }
  0x3b   :  { %347 = vmatprep.mubr.msk.bf16.mxu0 %vm479_vm0, %v478_v1  ;;  %353 = vmatprep.mubr.msk.bf16.mxu1 %vm479_vm0, %v478_v1  ;;  %v75_v3 = vld [vmem:[%s607_s2] sm:$0xf]  ;;  %v83_v5 = vsel %vm81_vm1, %v76_v2, 0  ;;  %v74_v7 = vpack.c.bf16 %v73_v4, %v73_v4  ;;  %v380_v11 = vld [vmem:[%s610_s5 + $0x8] sm:$0xff]   ;;  %v330_v14 = vld [vmem:[#allocation8] ss:$0 sm:$0xff] }
  0x3c   :  { %v131_v6 = vsel %vm129_vm2, %v75_v3, 0  ;;  %v71_v8 = vld [vmem:[%s605_s0] sm:$0x3]  ;;  %346 = vmatpush3.bf16.msra.mxu0 %v83_v5  ;;  %vm206_vm5 = vcmask 261120   ;;  %v480_v26 = vmov 0   ;;  %vm263_vm6 = vcmask 523264  }
  0x3d   :  { %352 = vmatpush3.bf16.msra.mxu1 %v131_v6  ;;  %v72_v9 = vpack.c.bf16 %v71_v8, %v71_v8  ;;  %357 = vmatprep.subr.bf16.mxu0 %v478_v1  ;;  %v379_v10 = vld [vmem:[%s610_s5] sm:$0xff]   ;;  %v260_v38 = vshrl.u32 %v259_v37, 7  ;;  %vm310_vm7 = vcmask 8192  }
  0x3e   :  { %365 = vmatprep.subr.bf16.mxu1 %v478_v1  ;;  %v253_v25 = vld [vmem:[#allocation2] sm:$0x1]  ;;  %378 = vset.pattern.permute.xlu0 %v480_v26 }
  0x3f   :  { %348 = vmatmul.mubr.msk.bf16.vlgmr.msra.gmra.mrb[0].mxu0 %vm77_vm3, %v74_v7  ;;  %256 = vperm.xlu0 %378, %v253_v25   ;;  %v331_v27 = vld [vmem:[%s611_s6] ss:$0 sm:$0xff]  ;;  %v261_v39 = vsub.s32 0, %v260_v38  ;;  %s481_s6 = smov [#allocation9]  }
  0x40   :  { %354 = vmatmul.mubr.msk.bf16.vlgmr.msra.gmra.mrb[0].mxu1 %vm125_vm4, %v72_v9  ;;  %361 = vmatprep.mubr.msk.bf16.mxu0 %vm479_vm0, %v478_v1  ;;  %v251_v36 = vld [vmem:[%s612_s7] sm:$0x1]  ;;  %s318_s10 = sshll.u32 %s481_s6, 4  ;;  %s319_s10 = int_to_ptr.vmem [resolvable:$true] %s318_s10 }
  0x41   :  { %367 = vmatprep.mubr.msk.bf16.mxu1 %vm479_vm0, %v478_v1  ;;  %358 = vmatpush3.bf16.msra.mxu0 %v379_v10  ;;  %s447_s3 = scalar_lea.vmem %s319_s10, 16  ;;  %s451_s11 = scalar_lea.vmem %s319_s10, 32 }
  0x42   :  { %359 = vmatprep.subr.bf16.mxu0 %v478_v1  ;;  %p448_p10 = scmp.ne.s32.totalorder %s319_s10, %s447_s3  ;;  %p452_p11 = scmp.lt.s32.totalorder %s319_s10, %s319_s10 }
  0x43   :  { %p453_p12 = scmp.lt.s32.totalorder %s451_s11, %s447_s3 }
  0x45   :  { %360 = vmatpush3.bf16.msra.mxu0 %v380_v11  ;;  %p454_p13 = por %p453_p12, %p452_p11 }
  0x47   :  { %p455_p0 = pnand %p454_p13, %p448_p10 }
  0xbe   :  { %v257_v40 = vpop.permute.xlu0 %256 }
  0xbf   :  { %v262_v41 = vrot.slane %v257_v40, %v261_v39 }
 0x112   :  { %v119_v12 = vpop.f32.mrb[0].mxu0 }
 0x113   :  { %v167_v13 = vpop.f32.mrb[0].mxu1  ;;  %v349_v16 = vpop.f32.mrb[1].mxu0 }
 0x114   :  { %v168_v15 = vadd.f32 %v167_v13, %v119_v12  ;;  %v355_v17 = vpop.f32.mrb[1].mxu1  ;;  %v122_v18 = vpop.f32.mrb[2].mxu0 }
 0x115   :  { %v170_v19 = vpop.f32.mrb[2].mxu1  ;;  %v350_v21 = vpop.f32.mrb[3].mxu0 }
 0x116   :  { %v180_v20 = vadd.f32 %v330_v14, %v168_v15  ;;  %v356_v22 = vpop.f32.mrb[3].mxu1 }
 0x118   :  { %v181_v23 = vmax.f32 %v180_v20, 0.0 }
 0x11a   :  { %v182_v24 = vpack.c.bf16 %v181_v23, %v181_v23 }
 0x11c   :  { %362 = vmatmul.mubr.msk.bf16.vlgmr.msra.gmra.mrb[4].mxu0 %vm206_vm5, %v182_v24 }
 0x1ef   :  { %v244_v28 = vpop.f32.mrb[4].mxu0 }
 0x1f0   :  { %v245_v29 = vadd.f32 %v331_v27, %v244_v28  ;;  %v363_v30 = vpop.f32.mrb[5].mxu0 }
 0x1f1   :  { %v247_v31 = vpop.f32.mrb[6].mxu0 }
 0x1f2   :  { %v250_v32 = vmax.f32 %v245_v29, 0.0  ;;  %v364_v33 = vpop.f32.mrb[7].mxu0 }
 0x1f4   :  { %v252_v34 = vpack.c.bf16 %v250_v32, %v250_v32 }
 0x1f6   :  { %v268_v35 = vsel %vm263_vm6, %v252_v34, 0 }
 0x1f7   :  { %366 = vmatpush3.bf16.xpose.msra.mxu1 %v268_v35 }
 0x1fe   :  { %368 = vmatmul.mubr.msk.bf16.vlgmr.msra.gmra.mrb[4].mxu1 %vm263_vm6, %v251_v36 }
 0x2d1   :  { %v304_v42 = vpop.f32.mrb[4].mxu1 }
 0x2d2   :  { %v305_v43 = vadd.f32 %v304_v42, %v262_v41  ;;  %v369_v44 = vpop.f32.mrb[5].mxu1 }
 0x2d3   :  { %v307_v45 = vpop.f32.mrb[6].mxu1 }
 0x2d4   :  { %v370_v46 = vpop.f32.mrb[7].mxu1  ;;  %311 = vst.msk [vmem:[#allocation9] sm:$0x1] %vm310_vm7, %v305_v43 }
 0x2d5   :  { %458 = shalt.err (!%p455_p0)
}
 0x2d6   :  { %s459_s13 = scalar_lea.hbm %s614_s9, 16 }
 0x2d7   :  { %p460_p1 = scmp.ne.s32.totalorder %s614_s9, %s459_s13  ;;  %p463_p2 = scmp.lt.u32.totalorder %s459_s13, %s614_s9 }
 0x2d9   :  { %p465_p3 = pnand %p463_p2, %p460_p1 }
 0x2db   :  { %468 = shalt.err (!%p465_p3)
}
 0x2dc   :  { %321 = dma.vmem_to_hbm [thread:$0]  %s319_s10, 16, %s614_s9, [#allocation5]  }
 0x2dd   :  { %473 = dma.done.wait [#allocation5], 16  }
 0x2de   :  { %474 = vsyncadd [#allocation5], 4294967280 }
 0x2df   :  { %325 = vsyncpa [#allocation4], 1 }
 0x2e0   :  { %326 = vsyncpa [#allocation7], 1 }
 0x2e1   :  { %327 = vsyncpa [#allocation5], 1 }

</bundles_post_ra>
